<compile_context>
chip_gen: v7x
topology: tpu7x:2x2x1
jax: 0.10.0
libtpu: 0.0.40
codegen_flags: <defaults>
</compile_context>

<pallas_src>
import numpy as np
import jax
import jax.numpy as jnp
from jax.experimental import pallas as pl
from jax.experimental.pallas import tpu as pltpu


ROWS_PER_SUPER = 128  # rows packed per lane-dense "super-row" (=> last dim % 128 == 0)


# ----------------------------------------------------------------------------
# Parameter / constant setup (plain numpy, mirrors the PyTorch __init__)
# ----------------------------------------------------------------------------
def make_mel_drop_p(input_dim: int) -> np.ndarray:
    """Reproduces the 'mel' branch of AttentionweightLayer.__init__ using
    linear interpolation (scipy.interpolate.interp1d default == np.interp)."""
    m = np.arange(0, 2840.023046708319)
    m = 700.0 * (10.0 ** (m / 2595.0) - 1.0)
    n = np.array([m[i] - m[i - 1] for i in range(1, len(m))])
    n = 1.0 / n
    lo, hi = np.min(m[1:]), np.max(m[1:])
    xnew = np.arange(lo, hi, (hi - lo) / input_dim)[:input_dim]
    ynew = np.interp(xnew, m[1:], n)
    ynew = np.asarray(ynew, dtype=np.float64)
    ynew /= ynew.max()
    return ynew.astype(np.float32)


# ----------------------------------------------------------------------------
# Pallas kernel: broadcast multiply of a (1, W) gate over (tm, W) tiles
# ----------------------------------------------------------------------------
def _gate_mul_kernel(gate_ref, x_ref, o_ref):
    # gate_ref: VMEM (1, W) f32;  x_ref/o_ref: VMEM (tm, W) in x.dtype.
    o_ref[...] = (x_ref[...] * gate_ref[...]).astype(o_ref.dtype)


def _round_up(v: int, m: int) -> int:
    return ((v + m - 1) // m) * m


def _choose_row_tile(n_rows: int, t_max: int, *, mult: int = 8, min_grid: int = 8) -> int:
    """Pick a row tile that is either the full extent or a multiple of `mult`,
    <= t_max, and small enough that the 'parallel' grid keeps >= min_grid steps
    (>= ~min_grid/2 steps per TensorCore on v7x) when the problem is large."""
    if n_rows <= t_max:
        return n_rows  # single full-extent block (exempt from the /8 rule)
    per_step = max(mult, _round_up(pl.cdiv(n_rows, min_grid), mult))
    t = min(t_max, per_step)
    return max(mult, (t // mult) * mult)


def _gate_multiply_2d(x2d, gate_row, *, tile_rows_max: int):
    """x2d: (R, W); gate_row: (1, W) f32.  Returns x2d * gate_row (broadcast)."""
    R, W = x2d.shape
    tr = _choose_row_tile(R, tile_rows_max)
    grid = (pl.cdiv(R, tr),)  # ragged last row-block is masked by Pallas
    return pl.pallas_call(
        _gate_mul_kernel,
        out_shape=jax.ShapeDtypeStruct((R, W), x2d.dtype),
        grid=grid,
        in_specs=[
            pl.BlockSpec((1, W), lambda i: (0, 0)),   # gate row (broadcast)
            pl.BlockSpec((tr, W), lambda i: (i, 0)),  # x tile
        ],
        out_specs=pl.BlockSpec((tr, W), lambda i: (i, 0)),
        compiler_params=pltpu.CompilerParams(
            dimension_semantics=("parallel",)),
    )(gate_row, x2d)


# ----------------------------------------------------------------------------
# Public wrapper
# ----------------------------------------------------------------------------
def attention_weight_layer(x, drop_p, w, b, *,
                           super_rows_per_block=32,   # lane-dense path: ~2.6 MB/step
                           fallback_row_tile=4096):   # fallback path:   ~2.6 MB/step
    """x: (B, C, T, F), drop_p: (F,), w/b: scalars.  Returns same shape as x."""
    B, C, T, F = x.shape
    assert drop_p.shape[-1] == F, (drop_p.shape, x.shape)

    rows = B * C * T
    x2d = x.reshape(rows, F)

    # Gate is only F elements: compute once on the host-side JAX graph (f32).
    gate = jax.nn.sigmoid(
        jnp.asarray(w, jnp.float32) * drop_p.astype(jnp.float32)
        + jnp.asarray(b, jnp.float32)
    ).reshape(1, F)

    G = ROWS_PER_SUPER
    if rows % G == 0 and rows >= G:
        # Lane-dense fast path: last dim = G*F is a multiple of 128 lanes.
        n_super = rows // G
        W = G * F
        x_main = x2d.reshape(n_super, W)          # free reshape (contiguous data)
        gate_wide = jnp.tile(gate, (1, G))        # (1, W): gate repeated per packed row
        out2d = _gate_multiply_2d(
            x_main, gate_wide, tile_rows_max=super_rows_per_block
        ).reshape(rows, F)
    else:
        # Fallback: native (rows, F) layout, big row tiles, no extra HBM passes.
        out2d = _gate_multiply_2d(x2d, gate, tile_rows_max=fallback_row_tile)

    return out2d.reshape(B, C, T, F)


# ----------------------------------------------------------------------------
# Reference (pure JAX) for correctness check
# ----------------------------------------------------------------------------
def attention_weight_ref(x, drop_p, w, b):
    gate = jax.nn.sigmoid(w * drop_p.reshape(1, 1, 1, -1).astype(jnp.float32) + b)
    return (x * gate).astype(x.dtype)


if __name__ == "__main__":
    input_dim = 161                       # default of the PyTorch module
    drop_p = jnp.asarray(make_mel_drop_p(input_dim))
    w = jnp.float32(2.0)                  # nn.Parameter(torch.tensor(2.0))
    b = jnp.float32(-1.0)                 # nn.Parameter(torch.tensor(-1.0))

    key0, key1 = jax.random.split(jax.random.PRNGKey(0))

    # Case 1: rows (= B*C*T = 256) divisible by 128 -> lane-dense fast path.
    B, C, T = 2, 4, 32
    x1 = jax.random.normal(key0, (B, C, T, input_dim), dtype=jnp.float32)
    out1 = jax.block_until_ready(attention_weight_layer(x1, drop_p, w, b))
    np.testing.assert_allclose(np.asarray(out1),
                               np.asarray(attention_weight_ref(x1, drop_p, w, b)),
                               rtol=1e-5, atol=1e-5)

    # Case 2: rows (= 72) NOT divisible by 128 -> native-layout fallback path.
    B2, C2, T2 = 2, 4, 9
    x2 = jax.random.normal(key1, (B2, C2, T2, input_dim), dtype=jnp.float32)
    out2 = jax.block_until_ready(attention_weight_layer(x2, drop_p, w, b))
    np.testing.assert_allclose(np.asarray(out2),
                               np.asarray(attention_weight_ref(x2, drop_p, w, b)),
                               rtol=1e-5, atol=1e-5)

    print("KERNEL_OK")
</pallas_src>

<mosaic_0001>
module attributes {stable_mosaic.version = 11 : i64} {
  func.func @_gate_mul_kernel(%arg0: i32, %arg1: memref<1x20608xf32, #tpu.memory_space<vmem>>, %arg2: memref<2x20608xf32, #tpu.memory_space<vmem>>, %arg3: memref<2x20608xf32, #tpu.memory_space<vmem>>) attributes {dimension_semantics = [#tpu.dimension_semantics<parallel>], iteration_bounds = array<i64: 1>, scalar_prefetch = 0 : i64, scratch_operands = 0 : i64, tpu.core_type = #tpu.core_type<tc>, window_params = [{pipeline_mode = #tpu.pipeline_mode<synchronous>, transform_indices = @transform_0, window_bounds = array<i64: 1, 20608>}, {transform_indices = @transform_1, window_bounds = array<i64: 2, 20608>}, {transform_indices = @transform_2, window_bounds = array<i64: 2, 20608>}]} {
    %c0 = arith.constant 0 : index
    %c0_0 = arith.constant 0 : index
    %0 = vector.load %arg2[%c0, %c0_0] : memref<2x20608xf32, #tpu.memory_space<vmem>>, vector<2x20608xf32>
    %c0_1 = arith.constant 0 : index
    %c0_2 = arith.constant 0 : index
    %1 = vector.load %arg1[%c0_1, %c0_2] : memref<1x20608xf32, #tpu.memory_space<vmem>>, vector<1x20608xf32>
    %2 = vector.broadcast %1 : vector<1x20608xf32> to vector<2x20608xf32>
    %3 = arith.mulf %0, %2 : vector<2x20608xf32>
    %c0_3 = arith.constant 0 : index
    %c0_4 = arith.constant 0 : index
    %4 = vector.load %arg3[%c0_3, %c0_4] : memref<2x20608xf32, #tpu.memory_space<vmem>>, vector<2x20608xf32>
    tpu.vector_store %arg3[%c0_3, %c0_4], %3 {strides = array<i32>} : memref<2x20608xf32, #tpu.memory_space<vmem>>, vector<2x20608xf32>,
    return
  }
  func.func @transform_0(%arg0: i32) -> (i32, i32) {
    %c0_i32 = arith.constant 0 : i32
    %c0_i32_0 = arith.constant 0 : i32
    %c0_i32_1 = arith.constant 0 : i32
    return %c0_i32, %c0_i32_0 : i32, i32
  }
  func.func @transform_1(%arg0: i32) -> (i32, i32) {
    %c0_i32 = arith.constant 0 : i32
    %c0_i32_0 = arith.constant 0 : i32
    return %arg0, %c0_i32 : i32, i32
  }
  func.func @transform_2(%arg0: i32) -> (i32, i32) {
    %c0_i32 = arith.constant 0 : i32
    %c0_i32_0 = arith.constant 0 : i32
    return %arg0, %c0_i32 : i32, i32
  }
}

</mosaic_0001>

<bundles_post_ra>
// kernel: tpu_custom_call.1
= control target key start
LH: loop header
LB: loop body
LE: loop exit
PB: predicated region body
PF: predicated region fallthrough
CT: control target
= control target key end

     0   :  { %7 = vsyncpa [#allocation3], 0  ;;  %s1980_s0 = inlined_call_operand.hbm [shape: f32[1,20608], index: 0, kind: input, shape index: {}]   ;;  %s1981_s1 = inlined_call_operand.hbm [shape: f32[2,20608], index: 1, kind: input, shape index: {}]   ;;  %s1982_s2 = inlined_call_operand.hbm [shape: f32[2,20608], index: 2, kind: output, shape index: {}]  }
   0x1   :  { %8 = vsyncpa [#allocation6], 0 }
   0x2   :  { %9 = vsyncpa [#allocation4], 0  ;;  %s1666_s9 = smov [#allocation2]   ;;  %s1667_s11 = smov [#allocation5]  }
   0x3   :  { %s16_s10 = sshll.u32 %s1666_s9, 4  ;;  %s26_s12 = sshll.u32 %s1667_s11, 4  ;;  %s17_s10 = int_to_ptr.vmem [resolvable:$true] %s16_s10  ;;  %s27_s12 = int_to_ptr.vmem [resolvable:$true] %s26_s12 }
   0x4   :  { %s1594_s15 = scalar_lea.hbm %s1980_s0, 2576 }
   0x5   :  { %p1595_p0 = scmp.ne.s32.totalorder %s1980_s0, %s1594_s15  ;;  %p1598_p1 = scmp.lt.u32.totalorder %s1594_s15, %s1980_s0 }
   0x7   :  { %p1600_p2 = pnand %p1598_p1, %p1595_p0 }
   0x9   :  { %1603 = shalt.err (!%p1600_p2)
}
   0xa   :  { %s1604_s20 = scalar_lea.vmem %s17_s10, 2576  ;;  %s1608_s21 = scalar_lea.vmem %s17_s10, 2592 }
   0xb   :  { %p1605_p3 = scmp.ne.s32.totalorder %s17_s10, %s1604_s20  ;;  %p1609_p4 = scmp.lt.s32.totalorder %s17_s10, %s17_s10 }
   0xc   :  { %p1610_p5 = scmp.lt.s32.totalorder %s1608_s21, %s1604_s20 }
   0xe   :  { %p1611_p6 = por %p1610_p5, %p1609_p4 }
  0x10   :  { %p1612_p7 = pnand %p1611_p6, %p1605_p3 }
  0x12   :  { %1615 = shalt.err (!%p1612_p7)
}
  0x13   :  { %19 = dma.hbm_to_vmem [thread:$0]  %s1980_s0, 2576, %s17_s10, [#allocation3]  }
  0x14   :  { %s1616_s26 = scalar_lea.hbm %s1981_s1, 5152 }
  0x15   :  { %p1617_p8 = scmp.ne.s32.totalorder %s1981_s1, %s1616_s26  ;;  %p1620_p9 = scmp.lt.u32.totalorder %s1616_s26, %s1981_s1 }
  0x17   :  { %p1622_p10 = pnand %p1620_p9, %p1617_p8 }
  0x19   :  { %1625 = shalt.err (!%p1622_p10)
}
  0x1a   :  { %s1626_s3 = scalar_lea.vmem %s27_s12, 5152  ;;  %p1631_p12 = scmp.lt.s32.totalorder %s27_s12, %s27_s12 }
  0x1b   :  { %p1627_p11 = scmp.ne.s32.totalorder %s27_s12, %s1626_s3  ;;  %p1632_p13 = scmp.lt.s32.totalorder %s1626_s3, %s1626_s3 }
  0x1d   :  { %p1633_p0 = por %p1632_p13, %p1631_p12 }
  0x1f   :  { %p1634_p1 = pnand %p1633_p0, %p1627_p11 }
  0x21   :  { %1637 = shalt.err (!%p1634_p1)
}
  0x22   :  { %29 = dma.hbm_to_vmem [thread:$0]  %s1981_s1, 5152, %s27_s12, [#allocation6]  }
  0x23   :  { %1660 = dma.done.wait [#allocation3], 2576  }
  0x24   :  { %1661 = vsyncadd [#allocation3], 4294964720 }
  0x25   :  { %1662 = dma.done.wait [#allocation6], 5152  }
  0x26   :  { %1663 = vsyncadd [#allocation6], 4294962144  ;;  %v119_v0 = vlaneseq  ;;  %v1668_v1 = vmov 1983009808   ;;  %v77_v13 = vld [vmem:[#allocation2] sm:$0xff]  ;;  %v78_v19 = vld [vmem:[#allocation2 + $0x8] sm:$0xff] }
  0x27   :  { %v766_v2 = vunpack.c.l.s4 %v1668_v1  ;;  %v79_v36 = vld [vmem:[#allocation2 + $0x10] sm:$0xff]  ;;  %v36_v37 = vld [vmem:[#allocation5] sm:$0xff]  ;;  %v80_v60 = vld [vmem:[#allocation2 + $0x18] sm:$0xff]  ;;  %s1669_s1 = smov [#allocation7]  }
  0x28   :  { %v120_v3 = vshrl.u32 %v119_v0, 7  ;;  %v37_v43 = vld [vmem:[#allocation5 + $0x8] sm:$0xff]  ;;  %v38_v52 = vld [vmem:[#allocation5 + $0x10] sm:$0xff]  ;;  %s1579_s5 = sshll.u32 %s1669_s1, 4  ;;  %s1580_s5 = int_to_ptr.vmem [resolvable:$true] %s1579_s5 }
  0x29   :  { %v767_v4 = vunpack.c.0.s8 %v766_v2  ;;  %v39_v2 = vld [vmem:[#allocation5 + $0x18] sm:$0xff]  ;;  %s1638_s6 = scalar_lea.vmem %s1580_s5, 5152  ;;  %p1643_p3 = scmp.lt.s32.totalorder %s1580_s5, %s1580_s5 }
  0x2a   :  { %v1709_v5 = vsub.s32 0, %v120_v3  ;;  %v1711_v6 = vsub.s32 1, %v120_v3  ;;  %v1713_v7 = vsub.s32 2, %v120_v3  ;;  %v1715_v8 = vsub.s32 3, %v120_v3  ;;  %p1639_p2 = scmp.ne.s32.totalorder %s1580_s5, %s1638_s6  ;;  %p1644_p4 = scmp.lt.s32.totalorder %s1638_s6, %s1638_s6 }
  0x2b   :  { %v1717_v9 = vsub.s32 4, %v120_v3  ;;  %v1719_v10 = vsub.s32 5, %v120_v3  ;;  %v1721_v11 = vsub.s32 6, %v120_v3  ;;  %v1723_v12 = vsub.s32 7, %v120_v3 }
  0x2c   :  { %v1725_v14 = vsub.s32 %v767_v4, %v120_v3  ;;  %v122_v15 = vrot.slane %v77_v13, %v1709_v5  ;;  %v126_v16 = vrot.slane %v77_v13, %v1711_v6  ;;  %v130_v17 = vrot.slane %v77_v13, %v1713_v7  ;;  %p1645_p5 = por %p1644_p4, %p1643_p3 }
  0x2d   :  { %v134_v18 = vrot.slane %v77_v13, %v1715_v8  ;;  %v138_v20 = vrot.slane %v77_v13, %v1717_v9  ;;  %v142_v21 = vrot.slane %v77_v13, %v1719_v10  ;;  %v146_v22 = vrot.slane %v77_v13, %v1721_v11 }
  0x2e   :  { %v150_v23 = vrot.slane %v77_v13, %v1723_v12  ;;  %v763_v24 = vcombine.low %v122_v15, %v126_v16  ;;  %v154_v26 = vrot.slane %v78_v19, %v1709_v5  ;;  %v158_v27 = vrot.slane %v78_v19, %v1711_v6  ;;  %p1646_p6 = pnand %p1645_p5, %p1639_p2 }
  0x2f   :  { %v764_v25 = vcombine.low %v130_v17, %v134_v18  ;;  %v780_v28 = vcombine.low %v138_v20, %v142_v21  ;;  %v162_v30 = vrot.slane %v78_v19, %v1713_v7  ;;  %v166_v31 = vrot.slane %v78_v19, %v1715_v8 }
  0x30   :  { %v781_v29 = vcombine.low %v146_v22, %v150_v23  ;;  %v771_v32 = vrot.slane %v763_v24, %v1725_v14  ;;  %v797_v34 = vcombine.low %v154_v26, %v158_v27  ;;  %v170_v35 = vrot.slane %v78_v19, %v1717_v9  ;;  %v81_v23 = vld [vmem:[#allocation2 + $0x20] sm:$0xff] }
  0x31   :  { %v778_v33 = vrot.slane %v764_v25, %v1725_v14  ;;  %v788_v38 = vrot.slane %v780_v28, %v1725_v14  ;;  %v798_v40 = vcombine.low %v162_v30, %v166_v31  ;;  %v174_v41 = vrot.slane %v78_v19, %v1719_v10  ;;  %v40_v25 = vld [vmem:[#allocation5 + $0x20] sm:$0xff] }
  0x32   :  { %v795_v39 = vrot.slane %v781_v29, %v1725_v14  ;;  %v805_v44 = vrot.slane %v797_v34, %v1725_v14  ;;  %v178_v45 = vrot.slane %v78_v19, %v1721_v11  ;;  %v182_v46 = vrot.slane %v78_v19, %v1723_v12 }
  0x33   :  { %v779_v42 = vcombine.low %v771_v32, %v778_v33  ;;  %v812_v48 = vrot.slane %v798_v40, %v1725_v14  ;;  %v814_v49 = vcombine.low %v170_v35, %v174_v41  ;;  %v186_v50 = vrot.slane %v79_v36, %v1709_v5  ;;  %v41_v33 = vld [vmem:[#allocation5 + $0x28] sm:$0xff] }
  0x34   :  { %v796_v47 = vcombine.low %v788_v38, %v795_v39  ;;  %v815_v53 = vcombine.low %v178_v45, %v182_v46  ;;  %v190_v54 = vrot.slane %v79_v36, %v1711_v6  ;;  %v194_v55 = vrot.slane %v79_v36, %v1713_v7  ;;  %v82_v46 = vld [vmem:[#allocation2 + $0x28] sm:$0xff] }
  0x35   :  { %v1491_v51 = vmul.f32 %v779_v42, %v36_v37  ;;  %v813_v57 = vcombine.low %v805_v44, %v812_v48  ;;  %v822_v58 = vrot.slane %v814_v49, %v1725_v14  ;;  %v198_v59 = vrot.slane %v79_v36, %v1715_v8  ;;  %v42_v48 = vld [vmem:[#allocation5 + $0x30] sm:$0xff] }
  0x36   :  { %v1492_v56 = vmul.f32 %v796_v47, %v37_v43  ;;  %v829_v61 = vrot.slane %v815_v53, %v1725_v14  ;;  %v831_v62 = vcombine.low %v186_v50, %v190_v54  ;;  %v202_v63 = vrot.slane %v79_v36, %v1717_v9 }
  0x37   :  { %1532 = vst [vmem:[#allocation7] sm:$0xff] %v1491_v51  ;;  %v206_v0 = vrot.slane %v79_v36, %v1719_v10  ;;  %v1493_v1 = vmul.f32 %v813_v57, %v38_v52  ;;  %v832_v3 = vcombine.low %v194_v55, %v198_v59  ;;  %v210_v4 = vrot.slane %v79_v36, %v1721_v11 }
  0x38   :  { %1533 = vst [vmem:[#allocation7 + $0x8] sm:$0xff] %v1492_v56  ;;  %v214_v13 = vrot.slane %v79_v36, %v1723_v12  ;;  %v830_v15 = vcombine.low %v822_v58, %v829_v61  ;;  %v839_v16 = vrot.slane %v831_v62, %v1725_v14  ;;  %v218_v18 = vrot.slane %v80_v60, %v1709_v5  ;;  %v43_v56 = vld [vmem:[#allocation5 + $0x38] sm:$0xff] }
  0x39   :  { %v848_v17 = vcombine.low %v202_v63, %v206_v0  ;;  %1534 = vst [vmem:[#allocation7 + $0x10] sm:$0xff] %v1493_v1  ;;  %v846_v19 = vrot.slane %v832_v3, %v1725_v14  ;;  %v222_v21 = vrot.slane %v80_v60, %v1711_v6  ;;  %v226_v22 = vrot.slane %v80_v60, %v1713_v7 }
  0x3a   :  { %v849_v20 = vcombine.low %v210_v4, %v214_v13  ;;  %v1494_v24 = vmul.f32 %v830_v15, %v39_v2  ;;  %v230_v27 = vrot.slane %v80_v60, %v1715_v8  ;;  %v234_v28 = vrot.slane %v80_v60, %v1717_v9  ;;  %v83_v13 = vld [vmem:[#allocation2 + $0x30] sm:$0xff] }
  0x3b   :  { %v856_v26 = vrot.slane %v848_v17, %v1725_v14  ;;  %v847_v29 = vcombine.low %v839_v16, %v846_v19  ;;  %v865_v31 = vcombine.low %v218_v18, %v222_v21  ;;  %v238_v32 = vrot.slane %v80_v60, %v1719_v10  ;;  %v44_v16 = vld [vmem:[#allocation5 + $0x40] sm:$0xff] }
  0x3c   :  { %v863_v30 = vrot.slane %v849_v20, %v1725_v14  ;;  %1535 = vst [vmem:[#allocation7 + $0x18] sm:$0xff] %v1494_v24  ;;  %v866_v34 = vcombine.low %v226_v22, %v230_v27  ;;  %v242_v35 = vrot.slane %v80_v60, %v1721_v11  ;;  %v246_v36 = vrot.slane %v80_v60, %v1723_v12  ;;  %v45_v24 = vld [vmem:[#allocation5 + $0x48] sm:$0xff] }
  0x3d   :  { %v250_v37 = vrot.slane %v81_v23, %v1709_v5  ;;  %v1495_v38 = vmul.f32 %v847_v29, %v40_v25  ;;  %v873_v40 = vrot.slane %v865_v31, %v1725_v14  ;;  %v882_v41 = vcombine.low %v234_v28, %v238_v32 }
  0x3e   :  { %v864_v39 = vcombine.low %v856_v26, %v863_v30  ;;  %v880_v42 = vrot.slane %v866_v34, %v1725_v14  ;;  %v883_v43 = vcombine.low %v242_v35, %v246_v36  ;;  %v254_v44 = vrot.slane %v81_v23, %v1711_v6 }
  0x3f   :  { %v258_v45 = vrot.slane %v81_v23, %v1713_v7  ;;  %1536 = vst [vmem:[#allocation7 + $0x20] sm:$0xff] %v1495_v38  ;;  %v890_v49 = vrot.slane %v882_v41, %v1725_v14  ;;  %v262_v50 = vrot.slane %v81_v23, %v1715_v8  ;;  %v266_v51 = vrot.slane %v81_v23, %v1717_v9 }
  0x40   :  { %v1496_v47 = vmul.f32 %v864_v39, %v41_v33  ;;  %v881_v52 = vcombine.low %v873_v40, %v880_v42  ;;  %v897_v53 = vrot.slane %v883_v43, %v1725_v14  ;;  %v899_v54 = vcombine.low %v250_v37, %v254_v44  ;;  %v84_v37 = vld [vmem:[#allocation2 + $0x38] sm:$0xff] }
  0x41   :  { %v270_v55 = vrot.slane %v81_v23, %v1719_v10  ;;  %v900_v57 = vcombine.low %v258_v45, %v262_v50  ;;  %v274_v58 = vrot.slane %v81_v23, %v1721_v11  ;;  %v278_v59 = vrot.slane %v81_v23, %v1723_v12  ;;  %v46_v39 = vld [vmem:[#allocation5 + $0x50] sm:$0xff] }
  0x42   :  { %1537 = vst [vmem:[#allocation7 + $0x28] sm:$0xff] %v1496_v47  ;;  %v282_v60 = vrot.slane %v82_v46, %v1709_v5  ;;  %v1497_v61 = vmul.f32 %v881_v52, %v42_v48  ;;  %v898_v62 = vcombine.low %v890_v49, %v897_v53  ;;  %v907_v63 = vrot.slane %v899_v54, %v1725_v14  ;;  %v47_v47 = vld [vmem:[#allocation5 + $0x58] sm:$0xff] }
  0x43   :  { %v916_v0 = vcombine.low %v266_v51, %v270_v55  ;;  %v914_v1 = vrot.slane %v900_v57, %v1725_v14  ;;  %v917_v2 = vcombine.low %v274_v58, %v278_v59  ;;  %v286_v3 = vrot.slane %v82_v46, %v1711_v6 }
  0x44   :  { %v290_v4 = vrot.slane %v82_v46, %v1713_v7  ;;  %1538 = vst [vmem:[#allocation7 + $0x30] sm:$0xff] %v1497_v61  ;;  %v1498_v15 = vmul.f32 %v898_v62, %v43_v56  ;;  %v294_v18 = vrot.slane %v82_v46, %v1715_v8  ;;  %v298_v19 = vrot.slane %v82_v46, %v1717_v9  ;;  %v48_v62 = vld [vmem:[#allocation5 + $0x60] sm:$0xff] }
  0x45   :  { %v924_v17 = vrot.slane %v916_v0, %v1725_v14  ;;  %v915_v20 = vcombine.low %v907_v63, %v914_v1  ;;  %v931_v21 = vrot.slane %v917_v2, %v1725_v14  ;;  %v933_v22 = vcombine.low %v282_v60, %v286_v3  ;;  %v85_v60 = vld [vmem:[#allocation2 + $0x40] sm:$0xff] }
  0x46   :  { %v302_v23 = vrot.slane %v82_v46, %v1719_v10  ;;  %1539 = vst [vmem:[#allocation7 + $0x38] sm:$0xff] %v1498_v15  ;;  %v934_v25 = vcombine.low %v290_v4, %v294_v18  ;;  %v306_v26 = vrot.slane %v82_v46, %v1721_v11  ;;  %v310_v27 = vrot.slane %v82_v46, %v1723_v12  ;;  %v49_v15 = vld [vmem:[#allocation5 + $0x68] sm:$0xff] }
  0x47   :  { %v314_v28 = vrot.slane %v83_v13, %v1709_v5  ;;  %v1499_v29 = vmul.f32 %v915_v20, %v44_v16  ;;  %v932_v30 = vcombine.low %v924_v17, %v931_v21  ;;  %v941_v31 = vrot.slane %v933_v22, %v1725_v14 }
  0x48   :  { %v950_v32 = vcombine.low %v298_v19, %v302_v23  ;;  %v948_v33 = vrot.slane %v934_v25, %v1725_v14  ;;  %v951_v34 = vcombine.low %v306_v26, %v310_v27  ;;  %v318_v35 = vrot.slane %v83_v13, %v1711_v6 }
  0x49   :  { %v322_v36 = vrot.slane %v83_v13, %v1713_v7  ;;  %1540 = vst [vmem:[#allocation7 + $0x40] sm:$0xff] %v1499_v29  ;;  %v1500_v38 = vmul.f32 %v932_v30, %v45_v24  ;;  %v326_v41 = vrot.slane %v83_v13, %v1715_v8  ;;  %v330_v42 = vrot.slane %v83_v13, %v1717_v9  ;;  %v50_v30 = vld [vmem:[#allocation5 + $0x70] sm:$0xff] }
  0x4a   :  { %v958_v40 = vrot.slane %v950_v32, %v1725_v14  ;;  %v949_v43 = vcombine.low %v941_v31, %v948_v33  ;;  %v965_v44 = vrot.slane %v951_v34, %v1725_v14  ;;  %v967_v45 = vcombine.low %v314_v28, %v318_v35  ;;  %v86_v28 = vld [vmem:[#allocation2 + $0x48] sm:$0xff] }
  0x4b   :  { %v334_v46 = vrot.slane %v83_v13, %v1719_v10  ;;  %1541 = vst [vmem:[#allocation7 + $0x48] sm:$0xff] %v1500_v38  ;;  %v968_v48 = vcombine.low %v322_v36, %v326_v41  ;;  %v338_v49 = vrot.slane %v83_v13, %v1721_v11  ;;  %v342_v50 = vrot.slane %v83_v13, %v1723_v12  ;;  %v51_v38 = vld [vmem:[#allocation5 + $0x78] sm:$0xff] }
  0x4c   :  { %v346_v51 = vrot.slane %v84_v37, %v1709_v5  ;;  %v1501_v52 = vmul.f32 %v949_v43, %v46_v39  ;;  %v966_v53 = vcombine.low %v958_v40, %v965_v44  ;;  %v975_v54 = vrot.slane %v967_v45, %v1725_v14 }
  0x4d   :  { %v984_v55 = vcombine.low %v330_v42, %v334_v46  ;;  %v982_v56 = vrot.slane %v968_v48, %v1725_v14  ;;  %v985_v57 = vcombine.low %v338_v49, %v342_v50  ;;  %v350_v58 = vrot.slane %v84_v37, %v1711_v6 }
  0x4e   :  { %v354_v59 = vrot.slane %v84_v37, %v1713_v7  ;;  %1542 = vst [vmem:[#allocation7 + $0x50] sm:$0xff] %v1501_v52  ;;  %v1502_v61 = vmul.f32 %v966_v53, %v47_v47  ;;  %v358_v0 = vrot.slane %v84_v37, %v1715_v8  ;;  %v362_v1 = vrot.slane %v84_v37, %v1717_v9  ;;  %v52_v53 = vld [vmem:[#allocation5 + $0x80] sm:$0xff] }
  0x4f   :  { %v992_v63 = vrot.slane %v984_v55, %v1725_v14  ;;  %v983_v2 = vcombine.low %v975_v54, %v982_v56  ;;  %v999_v3 = vrot.slane %v985_v57, %v1725_v14  ;;  %v1001_v4 = vcombine.low %v346_v51, %v350_v58  ;;  %v87_v51 = vld [vmem:[#allocation2 + $0x50] sm:$0xff] }
  0x50   :  { %v366_v13 = vrot.slane %v84_v37, %v1719_v10  ;;  %1543 = vst [vmem:[#allocation7 + $0x58] sm:$0xff] %v1502_v61  ;;  %v1002_v16 = vcombine.low %v354_v59, %v358_v0  ;;  %v370_v17 = vrot.slane %v84_v37, %v1721_v11  ;;  %v374_v18 = vrot.slane %v84_v37, %v1723_v12  ;;  %v53_v61 = vld [vmem:[#allocation5 + $0x88] sm:$0xff] }
  0x51   :  { %v378_v19 = vrot.slane %v85_v60, %v1709_v5  ;;  %v1503_v20 = vmul.f32 %v983_v2, %v48_v62  ;;  %v1000_v21 = vcombine.low %v992_v63, %v999_v3  ;;  %v1009_v22 = vrot.slane %v1001_v4, %v1725_v14 }
  0x52   :  { %v1018_v23 = vcombine.low %v362_v1, %v366_v13  ;;  %v1016_v24 = vrot.slane %v1002_v16, %v1725_v14  ;;  %v1019_v25 = vcombine.low %v370_v17, %v374_v18  ;;  %v382_v26 = vrot.slane %v85_v60, %v1711_v6 }
  0x53   :  { %v386_v27 = vrot.slane %v85_v60, %v1713_v7  ;;  %1544 = vst [vmem:[#allocation7 + $0x60] sm:$0xff] %v1503_v20  ;;  %v1504_v29 = vmul.f32 %v1000_v21, %v49_v15  ;;  %v390_v32 = vrot.slane %v85_v60, %v1715_v8  ;;  %v394_v33 = vrot.slane %v85_v60, %v1717_v9  ;;  %v54_v21 = vld [vmem:[#allocation5 + $0x90] sm:$0xff] }
  0x54   :  { %v1026_v31 = vrot.slane %v1018_v23, %v1725_v14  ;;  %v1017_v34 = vcombine.low %v1009_v22, %v1016_v24  ;;  %v1033_v35 = vrot.slane %v1019_v25, %v1725_v14  ;;  %v1035_v36 = vcombine.low %v378_v19, %v382_v26  ;;  %v88_v19 = vld [vmem:[#allocation2 + $0x58] sm:$0xff] }
  0x55   :  { %v398_v37 = vrot.slane %v85_v60, %v1719_v10  ;;  %1545 = vst [vmem:[#allocation7 + $0x68] sm:$0xff] %v1504_v29  ;;  %v1036_v39 = vcombine.low %v386_v27, %v390_v32  ;;  %v402_v40 = vrot.slane %v85_v60, %v1721_v11  ;;  %v406_v41 = vrot.slane %v85_v60, %v1723_v12  ;;  %v55_v29 = vld [vmem:[#allocation5 + $0x98] sm:$0xff] }
  0x56   :  { %v410_v42 = vrot.slane %v86_v28, %v1709_v5  ;;  %v1505_v43 = vmul.f32 %v1017_v34, %v50_v30  ;;  %v1034_v44 = vcombine.low %v1026_v31, %v1033_v35  ;;  %v1043_v45 = vrot.slane %v1035_v36, %v1725_v14 }
  0x57   :  { %v1052_v46 = vcombine.low %v394_v33, %v398_v37  ;;  %v1050_v47 = vrot.slane %v1036_v39, %v1725_v14  ;;  %v1053_v48 = vcombine.low %v402_v40, %v406_v41  ;;  %v414_v49 = vrot.slane %v86_v28, %v1711_v6 }
  0x58   :  { %v418_v50 = vrot.slane %v86_v28, %v1713_v7  ;;  %1546 = vst [vmem:[#allocation7 + $0x70] sm:$0xff] %v1505_v43  ;;  %v1506_v52 = vmul.f32 %v1034_v44, %v51_v38  ;;  %v422_v55 = vrot.slane %v86_v28, %v1715_v8  ;;  %v426_v56 = vrot.slane %v86_v28, %v1717_v9  ;;  %v56_v44 = vld [vmem:[#allocation5 + $0xa0] sm:$0xff] }
  0x59   :  { %v1060_v54 = vrot.slane %v1052_v46, %v1725_v14  ;;  %v1051_v57 = vcombine.low %v1043_v45, %v1050_v47  ;;  %v1067_v58 = vrot.slane %v1053_v48, %v1725_v14  ;;  %v1069_v59 = vcombine.low %v410_v42, %v414_v49  ;;  %v89_v42 = vld [vmem:[#allocation2 + $0x60] sm:$0xff] }
  0x5a   :  { %v430_v60 = vrot.slane %v86_v28, %v1719_v10  ;;  %1547 = vst [vmem:[#allocation7 + $0x78] sm:$0xff] %v1506_v52  ;;  %v1070_v62 = vcombine.low %v418_v50, %v422_v55  ;;  %v434_v63 = vrot.slane %v86_v28, %v1721_v11  ;;  %v438_v0 = vrot.slane %v86_v28, %v1723_v12  ;;  %v57_v52 = vld [vmem:[#allocation5 + $0xa8] sm:$0xff] }
  0x5b   :  { %v442_v1 = vrot.slane %v87_v51, %v1709_v5  ;;  %v1507_v2 = vmul.f32 %v1051_v57, %v52_v53  ;;  %v1068_v3 = vcombine.low %v1060_v54, %v1067_v58  ;;  %v1077_v4 = vrot.slane %v1069_v59, %v1725_v14 }
  0x5c   :  { %v1086_v13 = vcombine.low %v426_v56, %v430_v60  ;;  %v1084_v15 = vrot.slane %v1070_v62, %v1725_v14  ;;  %v1087_v16 = vcombine.low %v434_v63, %v438_v0  ;;  %v446_v17 = vrot.slane %v87_v51, %v1711_v6 }
  0x5d   :  { %v450_v18 = vrot.slane %v87_v51, %v1713_v7  ;;  %1548 = vst [vmem:[#allocation7 + $0x80] sm:$0xff] %v1507_v2  ;;  %v1508_v20 = vmul.f32 %v1068_v3, %v53_v61  ;;  %v454_v23 = vrot.slane %v87_v51, %v1715_v8  ;;  %v458_v24 = vrot.slane %v87_v51, %v1717_v9  ;;  %v58_v3 = vld [vmem:[#allocation5 + $0xb0] sm:$0xff] }
  0x5e   :  { %v1094_v22 = vrot.slane %v1086_v13, %v1725_v14  ;;  %v1085_v25 = vcombine.low %v1077_v4, %v1084_v15  ;;  %v1101_v26 = vrot.slane %v1087_v16, %v1725_v14  ;;  %v1103_v27 = vcombine.low %v442_v1, %v446_v17  ;;  %v90_v1 = vld [vmem:[#allocation2 + $0x68] sm:$0xff] }
  0x5f   :  { %v462_v28 = vrot.slane %v87_v51, %v1719_v10  ;;  %1549 = vst [vmem:[#allocation7 + $0x88] sm:$0xff] %v1508_v20  ;;  %v1104_v30 = vcombine.low %v450_v18, %v454_v23  ;;  %v466_v31 = vrot.slane %v87_v51, %v1721_v11  ;;  %v470_v32 = vrot.slane %v87_v51, %v1723_v12  ;;  %v59_v20 = vld [vmem:[#allocation5 + $0xb8] sm:$0xff] }
  0x60   :  { %v474_v33 = vrot.slane %v88_v19, %v1709_v5  ;;  %v1509_v34 = vmul.f32 %v1085_v25, %v54_v21  ;;  %v1102_v35 = vcombine.low %v1094_v22, %v1101_v26  ;;  %v1111_v36 = vrot.slane %v1103_v27, %v1725_v14 }
  0x61   :  { %v1120_v37 = vcombine.low %v458_v24, %v462_v28  ;;  %v1118_v38 = vrot.slane %v1104_v30, %v1725_v14  ;;  %v1121_v39 = vcombine.low %v466_v31, %v470_v32  ;;  %v478_v40 = vrot.slane %v88_v19, %v1711_v6 }
  0x62   :  { %v482_v41 = vrot.slane %v88_v19, %v1713_v7  ;;  %1550 = vst [vmem:[#allocation7 + $0x90] sm:$0xff] %v1509_v34  ;;  %v1510_v43 = vmul.f32 %v1102_v35, %v55_v29  ;;  %v486_v46 = vrot.slane %v88_v19, %v1715_v8  ;;  %v490_v47 = vrot.slane %v88_v19, %v1717_v9  ;;  %v60_v35 = vld [vmem:[#allocation5 + $0xc0] sm:$0xff] }
  0x63   :  { %v1128_v45 = vrot.slane %v1120_v37, %v1725_v14  ;;  %v1119_v48 = vcombine.low %v1111_v36, %v1118_v38  ;;  %v1135_v49 = vrot.slane %v1121_v39, %v1725_v14  ;;  %v1137_v50 = vcombine.low %v474_v33, %v478_v40  ;;  %v91_v33 = vld [vmem:[#allocation2 + $0x70] sm:$0xff] }
  0x64   :  { %v494_v51 = vrot.slane %v88_v19, %v1719_v10  ;;  %1551 = vst [vmem:[#allocation7 + $0x98] sm:$0xff] %v1510_v43  ;;  %v1138_v53 = vcombine.low %v482_v41, %v486_v46  ;;  %v498_v54 = vrot.slane %v88_v19, %v1721_v11  ;;  %v502_v55 = vrot.slane %v88_v19, %v1723_v12  ;;  %v61_v43 = vld [vmem:[#allocation5 + $0xc8] sm:$0xff] }
  0x65   :  { %v506_v56 = vrot.slane %v89_v42, %v1709_v5  ;;  %v1511_v57 = vmul.f32 %v1119_v48, %v56_v44  ;;  %v1136_v58 = vcombine.low %v1128_v45, %v1135_v49  ;;  %v1145_v59 = vrot.slane %v1137_v50, %v1725_v14 }
  0x66   :  { %v1154_v60 = vcombine.low %v490_v47, %v494_v51  ;;  %v1152_v61 = vrot.slane %v1138_v53, %v1725_v14  ;;  %v1155_v62 = vcombine.low %v498_v54, %v502_v55  ;;  %v510_v63 = vrot.slane %v89_v42, %v1711_v6 }
  0x67   :  { %v514_v0 = vrot.slane %v89_v42, %v1713_v7  ;;  %1552 = vst [vmem:[#allocation7 + $0xa0] sm:$0xff] %v1511_v57  ;;  %v1512_v2 = vmul.f32 %v1136_v58, %v57_v52  ;;  %v518_v13 = vrot.slane %v89_v42, %v1715_v8  ;;  %v522_v15 = vrot.slane %v89_v42, %v1717_v9  ;;  %v62_v58 = vld [vmem:[#allocation5 + $0xd0] sm:$0xff] }
  0x68   :  { %v1162_v4 = vrot.slane %v1154_v60, %v1725_v14  ;;  %v1153_v16 = vcombine.low %v1145_v59, %v1152_v61  ;;  %v1169_v17 = vrot.slane %v1155_v62, %v1725_v14  ;;  %v1171_v18 = vcombine.low %v506_v56, %v510_v63  ;;  %v92_v56 = vld [vmem:[#allocation2 + $0x78] sm:$0xff] }
  0x69   :  { %v526_v19 = vrot.slane %v89_v42, %v1719_v10  ;;  %1553 = vst [vmem:[#allocation7 + $0xa8] sm:$0xff] %v1512_v2  ;;  %v1172_v21 = vcombine.low %v514_v0, %v518_v13  ;;  %v530_v22 = vrot.slane %v89_v42, %v1721_v11  ;;  %v534_v23 = vrot.slane %v89_v42, %v1723_v12  ;;  %v63_v2 = vld [vmem:[#allocation5 + $0xd8] sm:$0xff] }
  0x6a   :  { %v538_v24 = vrot.slane %v90_v1, %v1709_v5  ;;  %v1513_v25 = vmul.f32 %v1153_v16, %v58_v3  ;;  %v1170_v26 = vcombine.low %v1162_v4, %v1169_v17  ;;  %v1179_v27 = vrot.slane %v1171_v18, %v1725_v14 }
  0x6b   :  { %v1188_v28 = vcombine.low %v522_v15, %v526_v19  ;;  %v1186_v29 = vrot.slane %v1172_v21, %v1725_v14  ;;  %v1189_v30 = vcombine.low %v530_v22, %v534_v23  ;;  %v542_v31 = vrot.slane %v90_v1, %v1711_v6 }
  0x6c   :  { %v546_v32 = vrot.slane %v90_v1, %v1713_v7  ;;  %1554 = vst [vmem:[#allocation7 + $0xb0] sm:$0xff] %v1513_v25  ;;  %v1514_v34 = vmul.f32 %v1170_v26, %v59_v20  ;;  %v550_v37 = vrot.slane %v90_v1, %v1715_v8  ;;  %v554_v38 = vrot.slane %v90_v1, %v1717_v9  ;;  %v64_v26 = vld [vmem:[#allocation5 + $0xe0] sm:$0xff] }
  0x6d   :  { %v1196_v36 = vrot.slane %v1188_v28, %v1725_v14  ;;  %v1187_v39 = vcombine.low %v1179_v27, %v1186_v29  ;;  %v1203_v40 = vrot.slane %v1189_v30, %v1725_v14  ;;  %v1205_v41 = vcombine.low %v538_v24, %v542_v31  ;;  %v93_v24 = vld [vmem:[#allocation2 + $0x80] sm:$0xff] }
  0x6e   :  { %v558_v42 = vrot.slane %v90_v1, %v1719_v10  ;;  %1555 = vst [vmem:[#allocation7 + $0xb8] sm:$0xff] %v1514_v34  ;;  %v1206_v44 = vcombine.low %v546_v32, %v550_v37  ;;  %v562_v45 = vrot.slane %v90_v1, %v1721_v11  ;;  %v566_v46 = vrot.slane %v90_v1, %v1723_v12  ;;  %v65_v34 = vld [vmem:[#allocation5 + $0xe8] sm:$0xff] }
  0x6f   :  { %v570_v47 = vrot.slane %v91_v33, %v1709_v5  ;;  %v1515_v48 = vmul.f32 %v1187_v39, %v60_v35  ;;  %v1204_v49 = vcombine.low %v1196_v36, %v1203_v40  ;;  %v1213_v50 = vrot.slane %v1205_v41, %v1725_v14 }
  0x70   :  { %v1222_v51 = vcombine.low %v554_v38, %v558_v42  ;;  %v1220_v52 = vrot.slane %v1206_v44, %v1725_v14  ;;  %v1223_v53 = vcombine.low %v562_v45, %v566_v46  ;;  %v574_v54 = vrot.slane %v91_v33, %v1711_v6 }
  0x71   :  { %v578_v55 = vrot.slane %v91_v33, %v1713_v7  ;;  %1556 = vst [vmem:[#allocation7 + $0xc0] sm:$0xff] %v1515_v48  ;;  %v1516_v57 = vmul.f32 %v1204_v49, %v61_v43  ;;  %v582_v60 = vrot.slane %v91_v33, %v1715_v8  ;;  %v586_v61 = vrot.slane %v91_v33, %v1717_v9  ;;  %v66_v49 = vld [vmem:[#allocation5 + $0xf0] sm:$0xff] }
  0x72   :  { %v1230_v59 = vrot.slane %v1222_v51, %v1725_v14  ;;  %v1221_v62 = vcombine.low %v1213_v50, %v1220_v52  ;;  %v1237_v63 = vrot.slane %v1223_v53, %v1725_v14  ;;  %v1239_v0 = vcombine.low %v570_v47, %v574_v54  ;;  %v94_v47 = vld [vmem:[#allocation2 + $0x88] sm:$0xff] }
  0x73   :  { %v590_v1 = vrot.slane %v91_v33, %v1719_v10  ;;  %1557 = vst [vmem:[#allocation7 + $0xc8] sm:$0xff] %v1516_v57  ;;  %v1240_v3 = vcombine.low %v578_v55, %v582_v60  ;;  %v594_v4 = vrot.slane %v91_v33, %v1721_v11  ;;  %v598_v13 = vrot.slane %v91_v33, %v1723_v12  ;;  %v67_v57 = vld [vmem:[#allocation5 + $0xf8] sm:$0xff] }
  0x74   :  { %v602_v15 = vrot.slane %v92_v56, %v1709_v5  ;;  %v1517_v16 = vmul.f32 %v1221_v62, %v62_v58  ;;  %v1238_v17 = vcombine.low %v1230_v59, %v1237_v63  ;;  %v1247_v18 = vrot.slane %v1239_v0, %v1725_v14 }
  0x75   :  { %v1256_v19 = vcombine.low %v586_v61, %v590_v1  ;;  %v1254_v20 = vrot.slane %v1240_v3, %v1725_v14  ;;  %v1257_v21 = vcombine.low %v594_v4, %v598_v13  ;;  %v606_v22 = vrot.slane %v92_v56, %v1711_v6 }
  0x76   :  { %v610_v23 = vrot.slane %v92_v56, %v1713_v7  ;;  %1558 = vst [vmem:[#allocation7 + $0xd0] sm:$0xff] %v1517_v16  ;;  %v1518_v25 = vmul.f32 %v1238_v17, %v63_v2  ;;  %v614_v28 = vrot.slane %v92_v56, %v1715_v8  ;;  %v618_v29 = vrot.slane %v92_v56, %v1717_v9  ;;  %v68_v17 = vld [vmem:[#allocation5 + $0x100] sm:$0xff] }
  0x77   :  { %v1264_v27 = vrot.slane %v1256_v19, %v1725_v14  ;;  %v1255_v30 = vcombine.low %v1247_v18, %v1254_v20  ;;  %v1271_v31 = vrot.slane %v1257_v21, %v1725_v14  ;;  %v1273_v32 = vcombine.low %v602_v15, %v606_v22  ;;  %v95_v15 = vld [vmem:[#allocation2 + $0x90] sm:$0xff] }
  0x78   :  { %v622_v33 = vrot.slane %v92_v56, %v1719_v10  ;;  %1559 = vst [vmem:[#allocation7 + $0xd8] sm:$0xff] %v1518_v25  ;;  %v1274_v35 = vcombine.low %v610_v23, %v614_v28  ;;  %v626_v36 = vrot.slane %v92_v56, %v1721_v11  ;;  %v630_v37 = vrot.slane %v92_v56, %v1723_v12  ;;  %v69_v25 = vld [vmem:[#allocation5 + $0x108] sm:$0xff] }
  0x79   :  { %v634_v38 = vrot.slane %v93_v24, %v1709_v5  ;;  %v1519_v39 = vmul.f32 %v1255_v30, %v64_v26  ;;  %v1272_v40 = vcombine.low %v1264_v27, %v1271_v31  ;;  %v1281_v41 = vrot.slane %v1273_v32, %v1725_v14 }
  0x7a   :  { %v1290_v42 = vcombine.low %v618_v29, %v622_v33  ;;  %v1288_v43 = vrot.slane %v1274_v35, %v1725_v14  ;;  %v1291_v44 = vcombine.low %v626_v36, %v630_v37  ;;  %v638_v45 = vrot.slane %v93_v24, %v1711_v6 }
  0x7b   :  { %v642_v46 = vrot.slane %v93_v24, %v1713_v7  ;;  %1560 = vst [vmem:[#allocation7 + $0xe0] sm:$0xff] %v1519_v39  ;;  %v1520_v48 = vmul.f32 %v1272_v40, %v65_v34  ;;  %v646_v51 = vrot.slane %v93_v24, %v1715_v8  ;;  %v650_v52 = vrot.slane %v93_v24, %v1717_v9  ;;  %v70_v40 = vld [vmem:[#allocation5 + $0x110] sm:$0xff] }
  0x7c   :  { %v1298_v50 = vrot.slane %v1290_v42, %v1725_v14  ;;  %v1289_v53 = vcombine.low %v1281_v41, %v1288_v43  ;;  %v1305_v54 = vrot.slane %v1291_v44, %v1725_v14  ;;  %v1307_v55 = vcombine.low %v634_v38, %v638_v45  ;;  %v96_v38 = vld [vmem:[#allocation2 + $0x98] sm:$0xff] }
  0x7d   :  { %v654_v56 = vrot.slane %v93_v24, %v1719_v10  ;;  %1561 = vst [vmem:[#allocation7 + $0xe8] sm:$0xff] %v1520_v48  ;;  %v1308_v58 = vcombine.low %v642_v46, %v646_v51  ;;  %v658_v59 = vrot.slane %v93_v24, %v1721_v11  ;;  %v662_v60 = vrot.slane %v93_v24, %v1723_v12  ;;  %v71_v48 = vld [vmem:[#allocation5 + $0x118] sm:$0xff] }
  0x7e   :  { %v666_v61 = vrot.slane %v94_v47, %v1709_v5  ;;  %v1521_v62 = vmul.f32 %v1289_v53, %v66_v49  ;;  %v1306_v63 = vcombine.low %v1298_v50, %v1305_v54  ;;  %v1315_v0 = vrot.slane %v1307_v55, %v1725_v14 }
  0x7f   :  { %v1324_v1 = vcombine.low %v650_v52, %v654_v56  ;;  %v1322_v2 = vrot.slane %v1308_v58, %v1725_v14  ;;  %v1325_v3 = vcombine.low %v658_v59, %v662_v60  ;;  %v670_v4 = vrot.slane %v94_v47, %v1711_v6 }
  0x80   :  { %v674_v13 = vrot.slane %v94_v47, %v1713_v7  ;;  %1562 = vst [vmem:[#allocation7 + $0xf0] sm:$0xff] %v1521_v62  ;;  %v1522_v16 = vmul.f32 %v1306_v63, %v67_v57  ;;  %v678_v19 = vrot.slane %v94_v47, %v1715_v8  ;;  %v682_v20 = vrot.slane %v94_v47, %v1717_v9  ;;  %v72_v63 = vld [vmem:[#allocation5 + $0x120] sm:$0xff] }
  0x81   :  { %v1332_v18 = vrot.slane %v1324_v1, %v1725_v14  ;;  %v1323_v21 = vcombine.low %v1315_v0, %v1322_v2  ;;  %v1339_v22 = vrot.slane %v1325_v3, %v1725_v14  ;;  %v1341_v23 = vcombine.low %v666_v61, %v670_v4  ;;  %v1589_v61 = vld [vmem:[#allocation2 + $0xa0] ss:$0 sm:$0xff] }
  0x82   :  { %v686_v24 = vrot.slane %v94_v47, %v1719_v10  ;;  %1563 = vst [vmem:[#allocation7 + $0xf8] sm:$0xff] %v1522_v16  ;;  %v1342_v26 = vcombine.low %v674_v13, %v678_v19  ;;  %v690_v27 = vrot.slane %v94_v47, %v1721_v11  ;;  %v694_v28 = vrot.slane %v94_v47, %v1723_v12 }
  0x83   :  { %v698_v29 = vrot.slane %v95_v15, %v1709_v5  ;;  %v1523_v30 = vmul.f32 %v1323_v21, %v68_v17  ;;  %v1340_v31 = vcombine.low %v1332_v18, %v1339_v22  ;;  %v1349_v32 = vrot.slane %v1341_v23, %v1725_v14 }
  0x84   :  { %v1358_v33 = vcombine.low %v682_v20, %v686_v24  ;;  %v1356_v34 = vrot.slane %v1342_v26, %v1725_v14  ;;  %v1359_v35 = vcombine.low %v690_v27, %v694_v28  ;;  %v702_v36 = vrot.slane %v95_v15, %v1711_v6  ;;  %v74_v24 = vld [vmem:[#allocation5 + $0x130] sm:$0xff] }
  0x85   :  { %v706_v37 = vrot.slane %v95_v15, %v1713_v7  ;;  %1564 = vst [vmem:[#allocation7 + $0x100] sm:$0xff] %v1523_v30  ;;  %v1524_v39 = vmul.f32 %v1340_v31, %v69_v25  ;;  %v710_v42 = vrot.slane %v95_v15, %v1715_v8  ;;  %v714_v43 = vrot.slane %v95_v15, %v1717_v9 }
  0x86   :  { %v1366_v41 = vrot.slane %v1358_v33, %v1725_v14  ;;  %v1357_v44 = vcombine.low %v1349_v32, %v1356_v34  ;;  %v1373_v45 = vrot.slane %v1359_v35, %v1725_v14  ;;  %v1375_v46 = vcombine.low %v698_v29, %v702_v36 }
  0x87   :  { %v718_v47 = vrot.slane %v95_v15, %v1719_v10  ;;  %1565 = vst [vmem:[#allocation7 + $0x108] sm:$0xff] %v1524_v39  ;;  %v1376_v49 = vcombine.low %v706_v37, %v710_v42  ;;  %v722_v50 = vrot.slane %v95_v15, %v1721_v11  ;;  %v726_v51 = vrot.slane %v95_v15, %v1723_v12  ;;  %v76_v15 = vld [vmem:[#allocation5 + $0x140] sm:$0x3] }
  0x88   :  { %v730_v52 = vrot.slane %v96_v38, %v1709_v5  ;;  %v1525_v53 = vmul.f32 %v1357_v44, %v70_v40  ;;  %v1374_v54 = vcombine.low %v1366_v41, %v1373_v45  ;;  %v1383_v55 = vrot.slane %v1375_v46, %v1725_v14 }
  0x89   :  { %v1392_v56 = vcombine.low %v714_v43, %v718_v47  ;;  %v1390_v57 = vrot.slane %v1376_v49, %v1725_v14  ;;  %v1393_v58 = vcombine.low %v722_v50, %v726_v51  ;;  %v734_v59 = vrot.slane %v96_v38, %v1711_v6  ;;  %v73_v6 = vld [vmem:[#allocation5 + $0x128] sm:$0xff] }
  0x8a   :  { %v738_v60 = vrot.slane %v96_v38, %v1713_v7  ;;  %1566 = vst [vmem:[#allocation7 + $0x110] sm:$0xff] %v1525_v53  ;;  %v1526_v62 = vmul.f32 %v1374_v54, %v71_v48  ;;  %v742_v5 = vrot.slane %v96_v38, %v1715_v8  ;;  %v746_v1 = vrot.slane %v96_v38, %v1717_v9 }
  0x8b   :  { %v1400_v0 = vrot.slane %v1392_v56, %v1725_v14  ;;  %v1391_v2 = vcombine.low %v1383_v55, %v1390_v57  ;;  %v1407_v3 = vrot.slane %v1393_v58, %v1725_v14  ;;  %v1409_v4 = vcombine.low %v730_v52, %v734_v59 }
  0x8c   :  { %v750_v13 = vrot.slane %v96_v38, %v1719_v10  ;;  %1567 = vst [vmem:[#allocation7 + $0x118] sm:$0xff] %v1526_v62  ;;  %v1410_v7 = vcombine.low %v738_v60, %v742_v5  ;;  %v754_v16 = vrot.slane %v96_v38, %v1721_v11  ;;  %v758_v17 = vrot.slane %v96_v38, %v1723_v12  ;;  %v75_v12 = vld [vmem:[#allocation5 + $0x138] sm:$0xff] }
  0x8d   :  { %v1449_v18 = vrot.slane %v1589_v61, %v1725_v14  ;;  %v1527_v19 = vmul.f32 %v1391_v2, %v72_v63  ;;  %v1408_v8 = vcombine.low %v1400_v0, %v1407_v3  ;;  %v1417_v9 = vrot.slane %v1409_v4, %v1725_v14 }
  0x8e   :  { %v1426_v20 = vcombine.low %v746_v1, %v750_v13  ;;  %v1424_v21 = vrot.slane %v1410_v7, %v1725_v14  ;;  %v1427_v22 = vcombine.low %v754_v16, %v758_v17 }
  0x8f   :  { %v1531_v23 = vmul.f32 %v1449_v18, %v76_v15  ;;  %1568 = vst [vmem:[#allocation7 + $0x120] sm:$0xff] %v1527_v19  ;;  %v1528_v10 = vmul.f32 %v1408_v8, %v73_v6 }
  0x90   :  { %v1434_v25 = vrot.slane %v1426_v20, %v1725_v14  ;;  %v1425_v26 = vcombine.low %v1417_v9, %v1424_v21  ;;  %v1441_v11 = vrot.slane %v1427_v22, %v1725_v14 }
  0x91   :  { %1572 = vst [vmem:[#allocation7 + $0x140] sm:$0x3] %v1531_v23  ;;  %1569 = vst [vmem:[#allocation7 + $0x128] sm:$0xff] %v1528_v10 }
  0x92   :  { %v1529_v27 = vmul.f32 %v1425_v26, %v74_v24  ;;  %v1442_v28 = vcombine.low %v1434_v25, %v1441_v11 }
  0x94   :  { %1570 = vst [vmem:[#allocation7 + $0x130] sm:$0xff] %v1529_v27  ;;  %v1530_v29 = vmul.f32 %v1442_v28, %v75_v12 }
  0x96   :  { %1571 = vst [vmem:[#allocation7 + $0x138] sm:$0xff] %v1530_v29 }
  0x97   :  { %1649 = shalt.err (!%p1646_p6)
}
  0x98   :  { %s1650_s9 = scalar_lea.hbm %s1982_s2, 5152 }
  0x99   :  { %p1651_p7 = scmp.ne.s32.totalorder %s1982_s2, %s1650_s9  ;;  %p1654_p8 = scmp.lt.u32.totalorder %s1650_s9, %s1982_s2 }
  0x9b   :  { %p1656_p9 = pnand %p1654_p8, %p1651_p7 }
  0x9d   :  { %1659 = shalt.err (!%p1656_p9)
}
  0x9e   :  { %1582 = dma.vmem_to_hbm [thread:$0]  %s1580_s5, 5152, %s1982_s2, [#allocation4]  }
  0x9f   :  { %1664 = dma.done.wait [#allocation4], 5152  }
  0xa0   :  { %1665 = vsyncadd [#allocation4], 4294962144 }
  0xa1   :  { %1586 = vsyncpa [#allocation3], 1 }
  0xa2   :  { %1587 = vsyncpa [#allocation6], 1 }
  0xa3   :  { %1588 = vsyncpa [#allocation4], 1 }

</bundles_post_ra>
